<compile_context>
chip_gen: v6e
topology: v6e:2x2x1
jax: 0.10.0
libtpu: 0.0.40
codegen_flags: <defaults>
</compile_context>

<pallas_src>
import jax
import jax.numpy as jnp
from jax import lax
from jax.experimental import pallas as pl
from jax.experimental.pallas import tpu as pltpu


def _round_up(v, m):
    return ((v + m - 1) // m) * m


def _vmem_limit_bytes():
    """Generation-aware VMEM budget: half of physical capacity, capped at 64 MiB.

    v5e/v6e: 128 MiB physical -> 64 MiB (raises the 16/32 MiB scoped defaults).
    v7x:      64 MiB physical -> 32 MiB (stays inside the scoped default).
    """
    cap = 64 * 1024 * 1024  # conservative fallback (v7x per-TensorCore physical)
    try:
        info = pltpu.get_tpu_info()
        cap = int(getattr(info, "vmem_capacity_bytes", cap))
    except Exception:
        pass
    return min(cap // 2, 64 * 1024 * 1024)


def _choose_batch_tile(batch, features, x_itemsize, vmem_limit):
    """Pick the batch-tile row count by VMEM-padded bytes, not by row count."""
    f_pad = _round_up(features, 128)                 # lane padding of the minor dim
    bytes_per_row = f_pad * x_itemsize
    # Headroom: resident (1, F) weight (sublane-padded, counted double-buffered),
    # double-buffered (G, 128) output blocks, and compiler scratch.
    headroom = 2 * 8 * f_pad * 4 + (2 << 20)
    per_block = int((vmem_limit - headroom) * 0.4)   # 2x double-buffered x blocks
    per_block = min(16 << 20, max(1 << 20, per_block))  # ~12 MiB v7x / 16 MiB v5e,v6e
    rows_budget = max(128, (per_block // bytes_per_row) // 128 * 128)
    rows_needed = max(128, (batch // 128) * 128)     # keep block rows <= array rows
    return min(rows_budget, rows_needed)             # multiple of 128


def linear_kernel(x_ref, w_ref, b_ref, o_ref):
    # x_ref: (TB, F) VMEM      w_ref: (1, F) VMEM (resident)
    # b_ref: (1, 1) SMEM       o_ref: (G, 128) VMEM, G = TB // 128
    n_groups = o_ref.shape[0]
    w = w_ref[...].astype(jnp.float32)               # lane-dense weight row
    b = b_ref[0, 0]
    # 128x128 identity mask, hoisted out of the loop.
    sub = lax.broadcasted_iota(jnp.int32, (128, 128), 0)
    lane = lax.broadcasted_iota(jnp.int32, (128, 128), 1)
    eye = sub == lane

    def body(g, carry):
        r0 = pl.multiple_of(g * 128, 128)
        xg = x_ref[pl.ds(r0, 128), :].astype(jnp.float32)     # (128, F)
        # Per-row dot product: VPU multiply + XLU lane reduce (MXU stays idle).
        col = jnp.sum(xg * w, axis=-1, keepdims=True)          # (128, 1)
        # Sublane->lane movement: select against the identity and reduce over
        # sublanes -> a lane-dense (1, 128) row.  A select (not a multiply) so
        # stale ragged-tail rows (possibly NaN/Inf) never touch valid lanes.
        row = jnp.sum(jnp.where(eye, col, 0.0), axis=0, keepdims=True)
        o_ref[pl.ds(g, 1), :] = (row + b).astype(o_ref.dtype)
        return carry

    lax.fori_loop(0, n_groups, body, 0)


def linear_net_forward(x, weight, bias):
    """Forward of LinearNet: y = x @ weight.T + bias.

    x: (B, F);  weight: (1, F) (PyTorch nn.Linear layout);  bias: (1,).
    Returns (B, 1) float32.
    """
    B, F = x.shape
    if x.dtype not in (jnp.float32, jnp.bfloat16):
        x = x.astype(jnp.float32)        # bf16 stays bf16 (halves HBM traffic)
    w = weight.astype(jnp.float32).reshape(1, F)
    b2d = bias.astype(jnp.float32).reshape(1, 1)

    # Tiny batches: pad up to one full 128-row block (negligible copy).  Larger
    # batches are NOT padded -- the ragged last block is handled by the cdiv grid.
    if B >= 128:
        x_k, b_k = x, B
    else:
        x_k, b_k = jnp.pad(x, ((0, 128 - B), (0, 0))), 128

    vmem_limit = _vmem_limit_bytes()
    tb = _choose_batch_tile(b_k, F, x_k.dtype.itemsize, vmem_limit)
    g = tb // 128
    num_tiles = int(pl.cdiv(b_k, tb))

    out = pl.pallas_call(
        linear_kernel,
        out_shape=jax.ShapeDtypeStruct((num_tiles, g, 128), jnp.float32),
        grid_spec=pltpu.PrefetchScalarGridSpec(
            num_scalar_prefetch=0,
            grid=(num_tiles,),
            in_specs=[
                # x: batch-tiled -> double-buffered pipeline; ragged tail handled
                # by the clamped DMA (rows are independent).
                pl.BlockSpec((tb, F), lambda i: (i, 0)),
                # weight: constant index_map -> stays resident, no per-step DMA.
                pl.BlockSpec((1, F), lambda i: (0, 0)),
                # bias: scalar in SMEM (no padded VMEM tile / extra DMA).
                pl.BlockSpec(memory_space=pltpu.MemorySpace.SMEM),
            ],
            # Lane-dense (G, 128) output slab per grid step (unmasked writeback).
            out_specs=pl.BlockSpec((None, g, 128), lambda i: (i, 0, 0)),
        ),
        compiler_params=pltpu.CompilerParams(
            dimension_semantics=("parallel",),   # megacore-shardable batch axis
            vmem_limit_bytes=vmem_limit,
        ),
    )(x_k, w, b2d)

    # Flat row-major order of the (num_tiles, g, 128) slab == batch order.
    return out.reshape(-1)[:B].reshape(B, 1)


if __name__ == "__main__":
    key = jax.random.PRNGKey(0)
    k_x, k_w, k_b, k_x2, k_x3 = jax.random.split(key, 5)

    n_features = 32
    weight = jax.random.normal(k_w, (1, n_features), dtype=jnp.float32) * 0.1
    bias = jax.random.normal(k_b, (1,), dtype=jnp.float32) * 0.1

    # Small batch (single 128-row block, padded-tail path).
    x1 = jax.random.normal(k_x, (8, n_features), dtype=jnp.float32)
    y1 = jax.block_until_ready(linear_net_forward(x1, weight, bias))
    assert y1.shape == (8, 1)
    assert jnp.allclose(y1, x1 @ weight.T + bias, atol=1e-5, rtol=1e-5)

    # Ragged batch, multiple grid steps (512 + partial 88 rows), no wrapper pad.
    x2 = jax.random.normal(k_x2, (600, n_features), dtype=jnp.float32)
    y2 = jax.block_until_ready(linear_net_forward(x2, weight, bias))
    assert y2.shape == (600, 1)
    assert jnp.allclose(y2, x2 @ weight.T + bias, atol=1e-4, rtol=1e-4)

    # Large multi-tile pipelined path (big byte-sized blocks) with a ragged tail.
    x3 = jax.random.normal(k_x3, (40000, n_features), dtype=jnp.float32)
    y3 = jax.block_until_ready(linear_net_forward(x3, weight, bias))
    assert y3.shape == (40000, 1)
    assert jnp.allclose(y3, x3 @ weight.T + bias, atol=1e-4, rtol=1e-4)

    print("KERNEL_OK")
</pallas_src>

<mosaic_0001>
module attributes {stable_mosaic.version = 11 : i64} {
  func.func @linear_kernel(%arg0: i32, %arg1: memref<128x32xf32, #tpu.memory_space<vmem>>, %arg2: memref<1x32xf32, #tpu.memory_space<vmem>>, %arg3: memref<1x1xf32, #tpu.memory_space<smem>>, %arg4: memref<1x1x128xf32, #tpu.memory_space<vmem>>) attributes {dimension_semantics = [#tpu.dimension_semantics<parallel>], iteration_bounds = array<i64: 1>, scalar_prefetch = 0 : i64, scratch_operands = 0 : i64, tpu.core_type = #tpu.core_type<tc>, window_params = [{transform_indices = @transform_0, window_bounds = array<i64: 128, 32>}, {pipeline_mode = #tpu.pipeline_mode<synchronous>, transform_indices = @transform_1, window_bounds = array<i64: 1, 32>}, {transform_indices = @transform_2, window_bounds = array<i64: 1, 1>}, {transform_indices = @transform_3, window_bounds = array<i64: 1, 1, 128>}]} {
    %c0 = arith.constant 0 : index
    %c0_0 = arith.constant 0 : index
    %0 = vector.load %arg2[%c0, %c0_0] : memref<1x32xf32, #tpu.memory_space<vmem>>, vector<1x32xf32>
    %c0_1 = arith.constant 0 : index
    %c0_2 = arith.constant 0 : index
    %1 = memref.load %arg3[%c0_1, %c0_2] : memref<1x1xf32, #tpu.memory_space<smem>>
    %2 = tpu.iota {dimensions = array<i32: 0>} : vector<128x128xi32>
    %3 = tpu.iota {dimensions = array<i32: 1>} : vector<128x128xi32>
    %4 = arith.cmpi eq, %2, %3 : vector<128x128xi32>
    %c0_i32 = arith.constant 0 : i32
    %c128_i32 = arith.constant 128 : i32
    %5 = arith.muli %c0_i32, %c128_i32 : i32
    %6 = tpu.assume_multiple %5, 128 : i32
    %7 = arith.index_cast %6 : i32 to index
    %c0_3 = arith.constant 0 : index
    %8 = vector.load %arg1[%7, %c0_3] : memref<128x32xf32, #tpu.memory_space<vmem>>, vector<128x32xf32>
    %9 = vector.broadcast %0 : vector<1x32xf32> to vector<128x32xf32>
    %10 = arith.mulf %8, %9 : vector<128x32xf32>
    %cst = arith.constant dense<0.000000e+00> : vector<128xf32>
    %11 = vector.multi_reduction <add>, %10, %cst [1] : vector<128x32xf32> to vector<128xf32>
    %12 = vector.shape_cast %11 : vector<128xf32> to vector<128x1xf32>
    %cst_4 = arith.constant 0.000000e+00 : f32
    %13 = vector.shape_cast %12 : vector<128x1xf32> to vector<128x1xf32>
    %14 = vector.broadcast %13 : vector<128x1xf32> to vector<128x128xf32>
    %15 = vector.broadcast %cst_4 : f32 to vector<128x128xf32>
    %16 = arith.select %4, %14, %15 : vector<128x128xi1>, vector<128x128xf32>
    %cst_5 = arith.constant dense<0.000000e+00> : vector<128xf32>
    %17 = vector.multi_reduction <add>, %16, %cst_5 [0] : vector<128x128xf32> to vector<128xf32>
    %18 = vector.shape_cast %17 : vector<128xf32> to vector<1x128xf32>
    %19 = vector.broadcast %1 : f32 to vector<1x128xf32>
    %20 = arith.addf %18, %19 : vector<1x128xf32>
    %c0_6 = arith.constant 0 : index
    %21 = arith.index_cast %c0_i32 : i32 to index
    %c0_7 = arith.constant 0 : index
    %22 = vector.load %arg4[%c0_6, %21, %c0_7] : memref<1x1x128xf32, #tpu.memory_space<vmem>>, vector<1x1x128xf32>
    %23 = vector.shape_cast %22 : vector<1x1x128xf32> to vector<1x128xf32>
    %24 = vector.shape_cast %20 : vector<1x128xf32> to vector<1x1x128xf32>
    tpu.vector_store %arg4[%c0_6, %21, %c0_7], %24 {strides = array<i32>} : memref<1x1x128xf32, #tpu.memory_space<vmem>>, vector<1x1x128xf32>,
    %c1_i32 = arith.constant 1 : i32
    return
  }
  func.func @transform_0(%arg0: i32) -> (i32, i32) {
    %c0_i32 = arith.constant 0 : i32
    %c0_i32_0 = arith.constant 0 : i32
    return %arg0, %c0_i32 : i32, i32
  }
  func.func @transform_1(%arg0: i32) -> (i32, i32) {
    %c0_i32 = arith.constant 0 : i32
    %c0_i32_0 = arith.constant 0 : i32
    %c0_i32_1 = arith.constant 0 : i32
    return %c0_i32, %c0_i32_0 : i32, i32
  }
  func.func @transform_2(%arg0: i32) -> (i32, i32) {
    %c0_i32 = arith.constant 0 : i32
    %c0_i32_0 = arith.constant 0 : i32
    %c0_i32_1 = arith.constant 0 : i32
    return %c0_i32, %c0_i32_0 : i32, i32
  }
  func.func @transform_3(%arg0: i32) -> (i32, i32, i32) {
    %c0_i32 = arith.constant 0 : i32
    %c0_i32_0 = arith.constant 0 : i32
    %c0_i32_1 = arith.constant 0 : i32
    return %arg0, %c0_i32, %c0_i32_0 : i32, i32, i32
  }
}

</mosaic_0001>

<bundles_post_ra>
// kernel: tpu_custom_call.1
= control target key start
LH: loop header
LB: loop body
LE: loop exit
PB: predicated region body
PF: predicated region fallthrough
CT: control target
= control target key end

     0   :  { %vm91_vm0 = vcmask 261120   ;;  %s348_s0 = inlined_call_operand.vmem [shape: f32[128,32], index: 0, kind: input, shape index: {}]   ;;  %s349_s1 = inlined_call_operand.vmem [shape: f32[1,32], index: 1, kind: input, shape index: {}]   ;;  %s350_s2 = inlined_call_operand.<no memory space> [shape: f32[1,1], index: 2, kind: input, shape index: {}]   ;;  %s351_s3 = inlined_call_operand.hbm [shape: f32[1,1,128], index: 3, kind: output, shape index: {}]  }
   0x1   :  { %v194_v0 = vld [vmem:[%s349_s1] ss:$0 sm:$0xff]  ;;  %v55_v2 = vld [vmem:[%s348_s0 + $0x10] sm:$0xff]  ;;  %v54_v5 = vld [vmem:[%s348_s0 + $0x8] sm:$0xff] }
   0x2   :  { %v53_v1 = vld [vmem:[%s348_s0] sm:$0xff]  ;;  %v77_v4 = vmul.f32 %v194_v0, %v55_v2  ;;  %v56_v6 = vld [vmem:[%s348_s0 + $0x18] sm:$0xff]  ;;  %v76_v7 = vmul.f32 %v194_v0, %v54_v5  ;;  %v58_v10 = vld [vmem:[%s348_s0 + $0x28] sm:$0xff] }
   0x3   :  { %v75_v3 = vmul.f32 %v194_v0, %v53_v1  ;;  %v78_v8 = vmul.f32 %v194_v0, %v56_v6  ;;  %v57_v9 = vld [vmem:[%s348_s0 + $0x20] sm:$0xff]  ;;  %v80_v16 = vmul.f32 %v194_v0, %v58_v10 }
   0x4   :  { %v98_v12 = vsel %vm91_vm0, %v77_v4, 0.0  ;;  %v95_v13 = vsel %vm91_vm0, %v76_v7, 0.0  ;;  %v79_v15 = vmul.f32 %v194_v0, %v57_v9 }
   0x5   :  { %v92_v11 = vsel %vm91_vm0, %v75_v3, 0.0  ;;  %99 = vadd.xlane.f32.xlu1 %v98_v12  ;;  %v101_v14 = vsel %vm91_vm0, %v78_v8, 0.0 }
   0x6   :  { %93 = vadd.xlane.f32.xlu0 %v92_v11 }
   0x7   :  { %9 = vsyncpa [#allocation4], 0  ;;  %v59_v17 = vld [vmem:[%s348_s0 + $0x30] sm:$0xff]  ;;  %v60_v18 = vld [vmem:[%s348_s0 + $0x38] sm:$0xff]  ;;  %v104_v19 = vsel %vm91_vm0, %v79_v15, 0.0  ;;  %v107_v20 = vsel %vm91_vm0, %v80_v16, 0.0  ;;  %v18_v49 = vlaneseq }
   0x8   :  { %v81_v21 = vmul.f32 %v194_v0, %v59_v17  ;;  %v82_v22 = vmul.f32 %v194_v0, %v60_v18  ;;  %v61_v23 = vld [vmem:[%s348_s0 + $0x40] sm:$0xff]  ;;  %v62_v24 = vld [vmem:[%s348_s0 + $0x48] sm:$0xff]  ;;  %v63_v29 = vld [vmem:[%s348_s0 + $0x50] sm:$0xff]  ;;  %s218_s19 = smov [#allocation3]  }
   0x9   :  { %102 = vadd.xlane.f32.xlu1 %v101_v14  ;;  %v83_v27 = vmul.f32 %v194_v0, %v61_v23  ;;  %v84_v28 = vmul.f32 %v194_v0, %v62_v24  ;;  %v64_v30 = vld [vmem:[%s348_s0 + $0x58] sm:$0xff]  ;;  %v85_v33 = vmul.f32 %v194_v0, %v63_v29  ;;  %v65_v35 = vld [vmem:[%s348_s0 + $0x60] sm:$0xff]  ;;  %v66_v36 = vld [vmem:[%s348_s0 + $0x68] sm:$0xff]  ;;  %v306_v50 = vshrl.u32 %v18_v49, 7  ;;  %s186_s20 = sshll.u32 %s218_s19, 4  ;;  %s187_s20 = int_to_ptr.vmem [resolvable:$true] %s186_s20 }
   0xa   :  { %96 = vadd.xlane.f32.xlu0 %v95_v13  ;;  %v110_v25 = vsel %vm91_vm0, %v81_v21, 0.0  ;;  %v113_v26 = vsel %vm91_vm0, %v82_v22, 0.0  ;;  %v86_v34 = vmul.f32 %v194_v0, %v64_v30  ;;  %v87_v39 = vmul.f32 %v194_v0, %v65_v35  ;;  %v67_v41 = vld [vmem:[%s348_s0 + $0x70] sm:$0xff]  ;;  %v68_v42 = vld [vmem:[%s348_s0 + $0x78] sm:$0xff]  ;;  %s196_s21 = scalar_lea.vmem %s187_s20, 16  ;;  %s200_s1 = scalar_lea.vmem %s187_s20, 32 }
   0xb   :  { %v116_v31 = vsel %vm91_vm0, %v83_v27, 0.0  ;;  %v119_v32 = vsel %vm91_vm0, %v84_v28, 0.0  ;;  %v122_v37 = vsel %vm91_vm0, %v85_v33, 0.0  ;;  %v88_v40 = vmul.f32 %v194_v0, %v66_v36  ;;  %p197_p0 = scmp.ne.s32.totalorder %s187_s20, %s196_s21  ;;  %p201_p1 = scmp.lt.s32.totalorder %s187_s20, %s187_s20 }
   0xc   :  { %v125_v38 = vsel %vm91_vm0, %v86_v34, 0.0  ;;  %v128_v43 = vsel %vm91_vm0, %v87_v39, 0.0  ;;  %v89_v45 = vmul.f32 %v194_v0, %v67_v41  ;;  %v90_v46 = vmul.f32 %v194_v0, %v68_v42  ;;  %p202_p2 = scmp.lt.s32.totalorder %s200_s1, %s196_s21 }
   0xd   :  { %108 = vadd.xlane.f32.xlu1 %v107_v20  ;;  %v131_v44 = vsel %vm91_vm0, %v88_v40, 0.0  ;;  %v308_v51 = vand.u32 127, %v18_v49  ;;  %v20_v52 = vadd.s32 8, %v306_v50  ;;  %v21_v54 = vadd.s32 16, %v306_v50 }
   0xe   :  { %105 = vadd.xlane.f32.xlu0 %v104_v19  ;;  %v134_v47 = vsel %vm91_vm0, %v89_v45, 0.0  ;;  %v137_v48 = vsel %vm91_vm0, %v90_v46, 0.0  ;;  %v22_v56 = vadd.s32 24, %v306_v50  ;;  %v23_v57 = vadd.s32 32, %v306_v50  ;;  %p203_p3 = por %p202_p2, %p201_p1 }
   0xf   :  { %vm37_vm1 = vcmp.eq.s32.totalorder %v306_v50, %v308_v51  ;;  %vm38_vm2 = vcmp.eq.s32.totalorder %v20_v52, %v308_v51  ;;  %vm39_vm3 = vcmp.eq.s32.totalorder %v21_v54, %v308_v51  ;;  %v24_v60 = vadd.s32 40, %v306_v50 }
  0x10   :  { %vm40_vm4 = vcmp.eq.s32.totalorder %v22_v56, %v308_v51  ;;  %vm41_vm5 = vcmp.eq.s32.totalorder %v23_v57, %v308_v51  ;;  %v25_v0 = vadd.s32 48, %v306_v50  ;;  %v26_v6 = vadd.s32 56, %v306_v50  ;;  %p204_p4 = pnand %p203_p3, %p197_p0 }
  0x11   :  { %114 = vadd.xlane.f32.xlu1 %v113_v26  ;;  %vm42_vm6 = vcmp.eq.s32.totalorder %v24_v60, %v308_v51  ;;  %v27_v9 = vadd.s32 64, %v306_v50  ;;  %v28_v14 = vadd.s32 72, %v306_v50  ;;  %v29_v17 = vadd.s32 80, %v306_v50 }
  0x12   :  { %111 = vadd.xlane.f32.xlu0 %v110_v25  ;;  %vm43_vm7 = vcmp.eq.s32.totalorder %v25_v0, %v308_v51  ;;  %vm44_vm8 = vcmp.eq.s32.totalorder %v26_v6, %v308_v51  ;;  %v30_v22 = vadd.s32 88, %v306_v50  ;;  %v31_v25 = vadd.s32 96, %v306_v50 }
  0x13   :  { %vm45_vm9 = vcmp.eq.s32.totalorder %v27_v9, %v308_v51  ;;  %vm46_vm10 = vcmp.eq.s32.totalorder %v28_v14, %v308_v51  ;;  %vm47_vm11 = vcmp.eq.s32.totalorder %v29_v17, %v308_v51  ;;  %v32_v30 = vadd.s32 104, %v306_v50 }
  0x14   :  { %vm48_vm12 = vcmp.eq.s32.totalorder %v30_v22, %v308_v51  ;;  %vm49_vm13 = vcmp.eq.s32.totalorder %v31_v25, %v308_v51  ;;  %v33_v33 = vadd.s32 112, %v306_v50  ;;  %v177_v56 = vstv %s350_s2 }
  0x15   :  { %120 = vadd.xlane.f32.xlu1 %v119_v32  ;;  %vm50_vm14 = vcmp.eq.s32.totalorder %v32_v30, %v308_v51 }
  0x16   :  { %117 = vadd.xlane.f32.xlu0 %v116_v31  ;;  %vm51_vm15 = vcmp.eq.s32.totalorder %v33_v33, %v308_v51 }
  0x19   :  { %126 = vadd.xlane.f32.xlu1 %v125_v38  ;;  %v34_v38 = vadd.s32 120, %v306_v50 }
  0x1a   :  { %123 = vadd.xlane.f32.xlu0 %v122_v37 }
  0x1b   :  { %vm52_vm0 = vcmp.eq.s32.totalorder %v34_v38, %v308_v51 }
  0x1d   :  { %132 = vadd.xlane.f32.xlu1 %v131_v44 }
  0x1e   :  { %129 = vadd.xlane.f32.xlu0 %v128_v43 }
  0x21   :  { %138 = vadd.xlane.f32.xlu1 %v137_v48 }
  0x22   :  { %135 = vadd.xlane.f32.xlu0 %v134_v47 }
  0x8e   :  { %v100_v55 = vpop.xlane.xlu1 %99 }
  0x8f   :  { %v94_v53 = vpop.xlane.xlu0 %93  ;;  %v142_v1 = vsel %vm39_vm3, %v100_v55, 0.0 }
  0x90   :  { %v140_v61 = vsel %vm37_vm1, %v94_v53, 0.0 }
  0x92   :  { %v103_v59 = vpop.xlane.xlu1 %102 }
  0x93   :  { %v97_v58 = vpop.xlane.xlu0 %96  ;;  %v143_v2 = vsel %vm40_vm4, %v103_v59, 0.0 }
  0x94   :  { %v141_v62 = vsel %vm38_vm2, %v97_v58, 0.0 }
  0x95   :  { %v156_v63 = vadd.f32 %v141_v62, %v140_v61 }
  0x96   :  { %v109_v5 = vpop.xlane.xlu1 %108 }
  0x97   :  { %v157_v3 = vadd.f32 %v156_v63, %v142_v1  ;;  %v106_v4 = vpop.xlane.xlu0 %105  ;;  %v145_v10 = vsel %vm42_vm6, %v109_v5, 0.0 }
  0x98   :  { %v144_v7 = vsel %vm41_vm5, %v106_v4, 0.0 }
  0x99   :  { %v158_v8 = vadd.f32 %v157_v3, %v143_v2 }
  0x9a   :  { %v115_v13 = vpop.xlane.xlu1 %114 }
  0x9b   :  { %v159_v11 = vadd.f32 %v158_v8, %v144_v7  ;;  %v112_v12 = vpop.xlane.xlu0 %111  ;;  %v147_v18 = vsel %vm44_vm8, %v115_v13, 0.0 }
  0x9c   :  { %v146_v15 = vsel %vm43_vm7, %v112_v12, 0.0 }
  0x9d   :  { %v160_v16 = vadd.f32 %v159_v11, %v145_v10 }
  0x9e   :  { %v121_v21 = vpop.xlane.xlu1 %120 }
  0x9f   :  { %v161_v19 = vadd.f32 %v160_v16, %v146_v15  ;;  %v118_v20 = vpop.xlane.xlu0 %117  ;;  %v149_v26 = vsel %vm46_vm10, %v121_v21, 0.0 }
  0xa0   :  { %v148_v23 = vsel %vm45_vm9, %v118_v20, 0.0 }
  0xa1   :  { %v162_v24 = vadd.f32 %v161_v19, %v147_v18 }
  0xa2   :  { %v127_v29 = vpop.xlane.xlu1 %126 }
  0xa3   :  { %v163_v27 = vadd.f32 %v162_v24, %v148_v23  ;;  %v124_v28 = vpop.xlane.xlu0 %123  ;;  %v151_v34 = vsel %vm48_vm12, %v127_v29, 0.0 }
  0xa4   :  { %v150_v31 = vsel %vm47_vm11, %v124_v28, 0.0 }
  0xa5   :  { %v164_v32 = vadd.f32 %v163_v27, %v149_v26 }
  0xa6   :  { %v133_v37 = vpop.xlane.xlu1 %132 }
  0xa7   :  { %v165_v35 = vadd.f32 %v164_v32, %v150_v31  ;;  %v130_v36 = vpop.xlane.xlu0 %129  ;;  %v153_v41 = vsel %vm50_vm14, %v133_v37, 0.0 }
  0xa8   :  { %v152_v39 = vsel %vm49_vm13, %v130_v36, 0.0 }
  0xa9   :  { %v166_v40 = vadd.f32 %v165_v35, %v151_v34 }
  0xaa   :  { %v139_v44 = vpop.xlane.xlu1 %138 }
  0xab   :  { %v167_v42 = vadd.f32 %v166_v40, %v152_v39  ;;  %v136_v43 = vpop.xlane.xlu0 %135  ;;  %v155_v47 = vsel %vm52_vm0, %v139_v44, 0.0 }
  0xac   :  { %v154_v45 = vsel %vm51_vm15, %v136_v43, 0.0 }
  0xad   :  { %v168_v46 = vadd.f32 %v167_v42, %v153_v41 }
  0xaf   :  { %v169_v48 = vadd.f32 %v168_v46, %v154_v45 }
  0xb1   :  { %v170_v49 = vadd.f32 %v169_v48, %v155_v47 }
  0xb3   :  { %v171_v52 = vrot.slane %v170_v49, 4 }
  0xb5   :  { %v172_v53 = vadd.f32 %v171_v52, %v170_v49 }
  0xb7   :  { %v173_v54 = vrot.slane %v172_v53, 2 }
  0xb9   :  { %v174_v55 = vadd.f32 %v173_v54, %v172_v53 }
  0xbb   :  { %v175_v50 = vrot.slane %v174_v55, 1 }
  0xbd   :  { %v176_v57 = vadd.f32 %v175_v50, %v174_v55 }
  0xbf   :  { %v178_v58 = vadd.f32 %v177_v56, %v176_v57 }
  0xc1   :  { %179 = vst [vmem:[#allocation3] sm:$0x1] %v178_v58 }
  0xc2   :  { %207 = shalt.err (!%p204_p4)
}
  0xc3   :  { %189 = dma.vmem_to_hbm [thread:$0]  %s187_s20, 16, %s351_s3, [#allocation4]  }
  0xc4   :  { %216 = dma.done.wait [#allocation4], 16  }
  0xc5   :  { %217 = vsyncadd [#allocation4], 4294967280 }
  0xc6   :  { %193 = vsyncpa [#allocation4], 1 }

</bundles_post_ra>
